<compile_context>
chip_gen: v7x
topology: tpu7x:2x2x1
jax: 0.10.0
libtpu: 0.0.40
codegen_flags: <defaults>
</compile_context>

<pallas_src>
import math
from functools import partial

import jax
import jax.numpy as jnp
from jax.experimental import pallas as pl
from jax.experimental.pallas import tpu as pltpu


_LANE = 128
_MAX_COLS = 2048                        # lane extent per tile (lane-dense)
_TILE_BYTE_BUDGET = 8 * 1024 * 1024     # per tile buffer; x4 buffers = 32 MiB VMEM
_VMEM_LIMIT_BYTES = 48 * 1024 * 1024    # <= v7x 64 MiB physical; fine on v5e/v6e


def _sublane_min(dtype):
    """Minimum legal sublane (second-to-last) tile extent for this dtype."""
    itemsize = jnp.dtype(dtype).itemsize
    return {4: 8, 2: 16, 1: 32}.get(itemsize, 8)


def _choose_cols(total):
    """Largest multiple of 128 (capped at _MAX_COLS) that divides `total`."""
    for c in range(_MAX_COLS, _LANE - 1, -_LANE):
        if total % c == 0:
            return c
    return None


def _choose_row_tile(rows, cols, itemsize, sub_min):
    """Largest dtype-aligned divisor of `rows` whose tile fits the VMEM budget."""
    if rows % sub_min != 0:
        # Full-extent block along rows (always a legal block shape).
        return rows
    if rows * cols * itemsize <= _TILE_BYTE_BUDGET:
        return rows
    q = rows // sub_min
    best = sub_min
    d = 1
    while d * d <= q:
        if q % d == 0:
            for f in (d, q // d):
                t = f * sub_min
                if t > best and t * cols * itemsize <= _TILE_BYTE_BUDGET:
                    best = t
        d += 1
    return best


def _identity_copy_kernel(x_ref, o_ref):
    # Pure pass-through: load the VMEM tile and store it unchanged.
    o_ref[...] = x_ref[...]


@partial(jax.jit, donate_argnums=(0,))
def model_base_forward(x):
    """Identity forward for the abstract ModelBase as a Pallas TPU kernel.

    The input buffer is donated and the copy runs in place
    (input_output_aliases), so no second full-size HBM buffer is allocated.
    Accepts any shape/dtype; returns a tensor of the same shape and dtype.
    """
    orig_shape = x.shape
    total = int(math.prod(orig_shape)) if orig_shape else 1
    itemsize = jnp.dtype(x.dtype).itemsize

    cols = _choose_cols(total)
    if cols is None:
        # TODO(synk): element count has no multiple-of-128 factor; fall back to
        # a single full-extent block (fine for small inputs, not tiled).
        cols = total
    rows = total // cols

    # Bitcast reshapes under jit: no extra HBM passes, no padding, no slicing.
    x2 = x.reshape(rows, cols)

    tr = _choose_row_tile(rows, cols, itemsize, _sublane_min(x.dtype))
    grid = (rows // tr,)

    out2 = pl.pallas_call(
        _identity_copy_kernel,
        out_shape=jax.ShapeDtypeStruct((rows, cols), x2.dtype),
        grid_spec=pltpu.PrefetchScalarGridSpec(
            num_scalar_prefetch=0,
            grid=grid,
            in_specs=[pl.BlockSpec((tr, cols), lambda i: (i, 0))],
            out_specs=pl.BlockSpec((tr, cols), lambda i: (i, 0)),
        ),
        input_output_aliases={0: 0},
        compiler_params=pltpu.CompilerParams(
            dimension_semantics=("parallel",),
            vmem_limit_bytes=_VMEM_LIMIT_BYTES,
        ),
    )(x2)

    return out2.reshape(orig_shape)


if __name__ == "__main__":
    key = jax.random.PRNGKey(0)
    shape, dtype = (2, 4, 16, 16), jnp.float32   # small NCHW input

    x = jax.random.normal(key, shape, dtype=dtype)
    y = jax.block_until_ready(model_base_forward(x))

    # `x` was donated (in-place identity); rebuild the identical reference
    # tensor deterministically from the same PRNG key for the check.
    x_check = jax.random.normal(key, shape, dtype=dtype)
    assert y.shape == x_check.shape and y.dtype == x_check.dtype
    assert bool(jnp.allclose(y, x_check))

    print("KERNEL_OK")
</pallas_src>

<mosaic_0001>
module attributes {stable_mosaic.version = 11 : i64} {
  func.func @_identity_copy_kernel(%arg0: i32, %arg1: memref<1x2048xf32, #tpu.memory_space<vmem>>, %arg2: memref<1x2048xf32, #tpu.memory_space<vmem>>) attributes {dimension_semantics = [#tpu.dimension_semantics<parallel>], iteration_bounds = array<i64: 1>, scalar_prefetch = 0 : i64, scratch_operands = 0 : i64, tpu.core_type = #tpu.core_type<tc>, window_params = [{transform_indices = @transform_0, window_bounds = array<i64: 1, 2048>}, {transform_indices = @transform_1, window_bounds = array<i64: 1, 2048>}]} {
    %c0 = arith.constant 0 : index
    %c0_0 = arith.constant 0 : index
    %0 = vector.load %arg1[%c0, %c0_0] : memref<1x2048xf32, #tpu.memory_space<vmem>>, vector<1x2048xf32>
    %c0_1 = arith.constant 0 : index
    %c0_2 = arith.constant 0 : index
    %1 = vector.load %arg2[%c0_1, %c0_2] : memref<1x2048xf32, #tpu.memory_space<vmem>>, vector<1x2048xf32>
    tpu.vector_store %arg2[%c0_1, %c0_2], %0 {strides = array<i32>} : memref<1x2048xf32, #tpu.memory_space<vmem>>, vector<1x2048xf32>,
    return
  }
  func.func @transform_0(%arg0: i32) -> (i32, i32) {
    %c0_i32 = arith.constant 0 : i32
    %c0_i32_0 = arith.constant 0 : i32
    return %arg0, %c0_i32 : i32, i32
  }
  func.func @transform_1(%arg0: i32) -> (i32, i32) {
    %c0_i32 = arith.constant 0 : i32
    %c0_i32_0 = arith.constant 0 : i32
    return %arg0, %c0_i32 : i32, i32
  }
}

</mosaic_0001>

<bundles_post_ra>
// kernel: model_base_forward.1
= control target key start
LH: loop header
LB: loop body
LE: loop exit
PB: predicated region body
PF: predicated region fallthrough
CT: control target
= control target key end

     0   :  { %s38_s0 = inlined_call_operand.vmem [shape: f32[1,2048], index: 0, kind: input, shape index: {}, may-alias: {0,1}]   ;;  %s39_s1 = inlined_call_operand.vmem [shape: f32[1,2048], index: 1, kind: output, shape index: {}, may-alias: {0,1}]  }
   0x1   :  { %v8_v0 = vld [vmem:[%s38_s0] sm:$0xff]  ;;  %v9_v1 = vld [vmem:[%s38_s0 + $0x8] sm:$0xff] }
   0x2   :  { %10 = vst [vmem:[%s39_s1] sm:$0xff] %v8_v0  ;;  %11 = vst [vmem:[%s39_s1 + $0x8] sm:$0xff] %v9_v1 }

</bundles_post_ra>
